<compile_context>
chip_gen: v7x
topology: tpu7x:2x2x1
jax: 0.10.0
libtpu: 0.0.40
codegen_flags: <defaults>
</compile_context>

<pallas_src>
import functools

import jax
import jax.numpy as jnp
from jax import lax
from jax.experimental import pallas as pl
from jax.experimental.pallas import tpu as pltpu


def _round_up(x, m):
    return ((x + m - 1) // m) * m


def _make_conv_kernel(tho, wo, c):
    """Kernel body specialized to (row-tile, output width, channels)."""

    def kernel(a0_ref, a1_ref, a2_ref, b0_ref, b1_ref, b2_ref,
               w_ref, bias_ref, out_ref):
        # a{kh}_ref : (1, tho, wo+1, c) bf16 -- even padded columns, row phase kh
        # b{kh}_ref : (1, tho, wo,   c) bf16 -- odd  padded columns, row phase kh
        # w_ref     : (9, c, c)        bf16 -- [kh*3+kw, c_in, c_out]
        # bias_ref  : (1, c)           f32
        # out_ref   : (1, tho, wo, c)  f32
        even = (a0_ref[0], a1_ref[0], a2_ref[0])   # (tho, wo+1, c)
        odd = (b0_ref[0], b1_ref[0], b2_ref[0])    # (tho, wo,   c)

        m = tho * wo
        acc = jnp.zeros((m, c), jnp.float32)
        for kh in range(3):
            e = even[kh]
            taps = (e[:, :wo, :],           # kw = 0 -> padded col 2*wo
                    odd[kh],                # kw = 1 -> padded col 2*wo + 1
                    e[:, 1:wo + 1, :])      # kw = 2 -> padded col 2*wo + 2
            for kw in range(3):
                t = taps[kw].reshape(m, c)
                acc = acc + jnp.dot(t, w_ref[kh * 3 + kw],
                                    preferred_element_type=jnp.float32)

        acc = acc + bias_ref[...]                                   # bias (f32)
        acc = jnp.where(acc > 0, acc, jnp.float32(0.01) * acc)      # LeakyReLU
        out_ref[...] = acc.reshape(1, tho, wo, c)

    return kernel


@functools.partial(jax.jit, static_argnames=("row_tile",))
def downsampling_forward(x_nchw, weight, bias, *, row_tile=8):
    """Conv2d(C, C, 3, stride=2, padding=1) + LeakyReLU(0.01).

    x_nchw : (B, C, H, W) float32
    weight : (C, C, 3, 3) float32 (PyTorch layout: out, in, kh, kw)
    bias   : (C,) float32
    returns: (B, C, Ho, Wo) float32
    """
    B, C, H, W = x_nchw.shape
    Ho = (H + 2 - 3) // 2 + 1
    Wo = (W + 2 - 3) // 2 + 1

    # NHWC + explicit padding=1.
    x_nhwc = jnp.transpose(x_nchw, (0, 2, 3, 1))
    xp = jnp.pad(x_nhwc, ((0, 0), (1, 1), (1, 1), (0, 0)))

    # Phase split: for each kernel row kh keep only the padded rows a stride-2
    # output touches (rows 2*ho + kh), split by column parity so every tap is a
    # unit-stride static slice of the VMEM tile inside the kernel.
    even_cols, odd_cols = [], []
    for kh in range(3):
        rows = xp[:, kh:kh + 2 * Ho:2, :, :]                       # (B, Ho, W+2, C)
        even_cols.append(rows[:, :, 0::2, :][:, :, :Wo + 1, :])    # (B, Ho, Wo+1, C)
        odd_cols.append(rows[:, :, 1::2, :][:, :, :Wo, :])         # (B, Ho, Wo,   C)

    # M-tiling: pad the output-row axis up to a multiple of the row tile.
    tho = max(1, min(row_tile, Ho))
    Hop = _round_up(Ho, tho)
    if Hop != Ho:
        rpad = ((0, 0), (0, Hop - Ho), (0, 0), (0, 0))
        even_cols = [jnp.pad(a, rpad) for a in even_cols]
        odd_cols = [jnp.pad(a, rpad) for a in odd_cols]

    # bf16 operands, f32 accumulation inside the kernel.
    even_cols = [a.astype(jnp.bfloat16) for a in even_cols]
    odd_cols = [a.astype(jnp.bfloat16) for a in odd_cols]

    # (C_out, C_in, kh, kw) -> (kh*3+kw, C_in, C_out); stays VMEM-resident.
    w9 = jnp.transpose(weight, (2, 3, 1, 0)).reshape(9, C, C).astype(jnp.bfloat16)
    bias_row = bias.reshape(1, C).astype(jnp.float32)

    grid = (B, Hop // tho)
    blk_even = pl.BlockSpec((1, tho, Wo + 1, C), lambda b, i: (b, i, 0, 0))
    blk_odd = pl.BlockSpec((1, tho, Wo, C), lambda b, i: (b, i, 0, 0))

    out = pl.pallas_call(
        _make_conv_kernel(tho, Wo, C),
        out_shape=jax.ShapeDtypeStruct((B, Hop, Wo, C), jnp.float32),
        grid=grid,
        in_specs=[blk_even, blk_even, blk_even,
                  blk_odd, blk_odd, blk_odd,
                  pl.BlockSpec((9, C, C), lambda b, i: (0, 0, 0)),   # weights (resident)
                  pl.BlockSpec((1, C), lambda b, i: (0, 0))],        # bias    (resident)
        out_specs=pl.BlockSpec((1, tho, Wo, C), lambda b, i: (b, i, 0, 0)),
        compiler_params=pltpu.CompilerParams(
            dimension_semantics=("parallel", "parallel")),
    )(*even_cols, *odd_cols, w9, bias_row)

    out = out[:, :Ho]                        # drop row-tile padding (if any)
    return jnp.transpose(out, (0, 3, 1, 2))  # NHWC -> NCHW


def _reference_forward(x_nchw, weight, bias):
    """Pure-JAX reference (lax conv) for correctness check."""
    y = lax.conv_general_dilated(
        x_nchw, weight,
        window_strides=(2, 2),
        padding=((1, 1), (1, 1)),
        dimension_numbers=("NCHW", "OIHW", "NCHW"),
        precision=lax.Precision.HIGHEST,
    )
    y = y + bias.reshape(1, -1, 1, 1)
    return jnp.where(y > 0, y, 0.01 * y)


if __name__ == "__main__":
    B, C, H, W = 2, 4, 16, 16
    key = jax.random.PRNGKey(0)
    kx, kw_key, kb = jax.random.split(key, 3)

    x = jax.random.normal(kx, (B, C, H, W), dtype=jnp.float32)
    # Deterministic synthetic Conv2d(C, C, 3) parameters.
    fan_in = C * 3 * 3
    bound = 1.0 / (fan_in ** 0.5)
    weight = jax.random.uniform(kw_key, (C, C, 3, 3), jnp.float32, -bound, bound)
    bias = jax.random.uniform(kb, (C,), jnp.float32, -bound, bound)

    out = jax.block_until_ready(downsampling_forward(x, weight, bias))
    assert out.shape == (B, C, H // 2, W // 2), out.shape

    # Tight check: reference fed the same bf16-rounded operands the kernel
    # multiplies (accumulation is f32 in both paths).
    x_r = x.astype(jnp.bfloat16).astype(jnp.float32)
    w_r = weight.astype(jnp.bfloat16).astype(jnp.float32)
    ref = _reference_forward(x_r, w_r, bias)
    assert jnp.allclose(out, ref, atol=2e-3, rtol=2e-3), "mismatch vs bf16-rounded reference"

    # Loose sanity check against the full-f32 reference (bf16 input rounding).
    ref_f32 = _reference_forward(x, weight, bias)
    assert jnp.allclose(out, ref_f32, atol=1e-1, rtol=1e-1), "mismatch vs f32 reference"

    print("KERNEL_OK")
</pallas_src>

<mosaic_0001>
module attributes {stable_mosaic.version = 11 : i64} {
  func.func @kernel(%arg0: i32, %arg1: i32, %arg2: memref<1x8x9x4xbf16, #tpu.memory_space<vmem>>, %arg3: memref<1x8x9x4xbf16, #tpu.memory_space<vmem>>, %arg4: memref<1x8x9x4xbf16, #tpu.memory_space<vmem>>, %arg5: memref<1x8x8x4xbf16, #tpu.memory_space<vmem>>, %arg6: memref<1x8x8x4xbf16, #tpu.memory_space<vmem>>, %arg7: memref<1x8x8x4xbf16, #tpu.memory_space<vmem>>, %arg8: memref<9x4x4xbf16, #tpu.memory_space<vmem>>, %arg9: memref<1x4xf32, #tpu.memory_space<vmem>>, %arg10: memref<1x8x8x4xf32, #tpu.memory_space<vmem>>) attributes {dimension_semantics = [#tpu.dimension_semantics<parallel>, #tpu.dimension_semantics<parallel>], iteration_bounds = array<i64: 2, 1>, scalar_prefetch = 0 : i64, scratch_operands = 0 : i64, tpu.core_type = #tpu.core_type<tc>, window_params = [{transform_indices = @transform_0, window_bounds = array<i64: 1, 8, 9, 4>}, {transform_indices = @transform_1, window_bounds = array<i64: 1, 8, 9, 4>}, {transform_indices = @transform_2, window_bounds = array<i64: 1, 8, 9, 4>}, {transform_indices = @transform_3, window_bounds = array<i64: 1, 8, 8, 4>}, {transform_indices = @transform_4, window_bounds = array<i64: 1, 8, 8, 4>}, {transform_indices = @transform_5, window_bounds = array<i64: 1, 8, 8, 4>}, {pipeline_mode = #tpu.pipeline_mode<synchronous>, transform_indices = @transform_6, window_bounds = array<i64: 9, 4, 4>}, {pipeline_mode = #tpu.pipeline_mode<synchronous>, transform_indices = @transform_7, window_bounds = array<i64: 1, 4>}, {transform_indices = @transform_8, window_bounds = array<i64: 1, 8, 8, 4>}]} {
    %c0 = arith.constant 0 : index
    %c0_0 = arith.constant 0 : index
    %c0_1 = arith.constant 0 : index
    %c0_2 = arith.constant 0 : index
    %0 = vector.load %arg2[%c0, %c0_0, %c0_1, %c0_2] : memref<1x8x9x4xbf16, #tpu.memory_space<vmem>>, vector<1x8x9x4xbf16>
    %1 = vector.shape_cast %0 : vector<1x8x9x4xbf16> to vector<8x9x4xbf16>
    %c0_3 = arith.constant 0 : index
    %c0_4 = arith.constant 0 : index
    %c0_5 = arith.constant 0 : index
    %c0_6 = arith.constant 0 : index
    %2 = vector.load %arg3[%c0_3, %c0_4, %c0_5, %c0_6] : memref<1x8x9x4xbf16, #tpu.memory_space<vmem>>, vector<1x8x9x4xbf16>
    %3 = vector.shape_cast %2 : vector<1x8x9x4xbf16> to vector<8x9x4xbf16>
    %c0_7 = arith.constant 0 : index
    %c0_8 = arith.constant 0 : index
    %c0_9 = arith.constant 0 : index
    %c0_10 = arith.constant 0 : index
    %4 = vector.load %arg4[%c0_7, %c0_8, %c0_9, %c0_10] : memref<1x8x9x4xbf16, #tpu.memory_space<vmem>>, vector<1x8x9x4xbf16>
    %5 = vector.shape_cast %4 : vector<1x8x9x4xbf16> to vector<8x9x4xbf16>
    %c0_11 = arith.constant 0 : index
    %c0_12 = arith.constant 0 : index
    %c0_13 = arith.constant 0 : index
    %c0_14 = arith.constant 0 : index
    %6 = vector.load %arg5[%c0_11, %c0_12, %c0_13, %c0_14] : memref<1x8x8x4xbf16, #tpu.memory_space<vmem>>, vector<1x8x8x4xbf16>
    %7 = vector.shape_cast %6 : vector<1x8x8x4xbf16> to vector<8x8x4xbf16>
    %c0_15 = arith.constant 0 : index
    %c0_16 = arith.constant 0 : index
    %c0_17 = arith.constant 0 : index
    %c0_18 = arith.constant 0 : index
    %8 = vector.load %arg6[%c0_15, %c0_16, %c0_17, %c0_18] : memref<1x8x8x4xbf16, #tpu.memory_space<vmem>>, vector<1x8x8x4xbf16>
    %9 = vector.shape_cast %8 : vector<1x8x8x4xbf16> to vector<8x8x4xbf16>
    %c0_19 = arith.constant 0 : index
    %c0_20 = arith.constant 0 : index
    %c0_21 = arith.constant 0 : index
    %c0_22 = arith.constant 0 : index
    %10 = vector.load %arg7[%c0_19, %c0_20, %c0_21, %c0_22] : memref<1x8x8x4xbf16, #tpu.memory_space<vmem>>, vector<1x8x8x4xbf16>
    %11 = vector.shape_cast %10 : vector<1x8x8x4xbf16> to vector<8x8x4xbf16>
    %cst = arith.constant 0.000000e+00 : f32
    %12 = vector.broadcast %cst : f32 to vector<64x4xf32>
    %13 = vector.extract_strided_slice %1 {offsets = [0, 0, 0], sizes = [8, 8, 4], strides = [1, 1, 1]} : vector<8x9x4xbf16> to vector<8x8x4xbf16>
    %14 = vector.extract_strided_slice %1 {offsets = [0, 1, 0], sizes = [8, 8, 4], strides = [1, 1, 1]} : vector<8x9x4xbf16> to vector<8x8x4xbf16>
    %15 = vector.shape_cast %13 : vector<8x8x4xbf16> to vector<64x4xbf16>
    %c0_23 = arith.constant 0 : index
    %c0_24 = arith.constant 0 : index
    %c0_25 = arith.constant 0 : index
    %16 = vector.load %arg8[%c0_23, %c0_24, %c0_25] : memref<9x4x4xbf16, #tpu.memory_space<vmem>>, vector<1x4x4xbf16>
    %17 = vector.shape_cast %16 : vector<1x4x4xbf16> to vector<4x4xbf16>
    %cst_26 = arith.constant dense<0.000000e+00> : vector<64x4xf32>
    %18 = tpu.matmul %15, %17, %cst_26 {dimension_numbers = #tpu.dot_dimension_numbers<[1], [0], [0], [1], [0, 0, 1, 1], [], []>} : vector<64x4xbf16>, vector<4x4xbf16>, vector<64x4xf32> -> vector<64x4xf32>
    %19 = arith.addf %12, %18 : vector<64x4xf32>
    %20 = vector.shape_cast %7 : vector<8x8x4xbf16> to vector<64x4xbf16>
    %c1 = arith.constant 1 : index
    %c0_27 = arith.constant 0 : index
    %c0_28 = arith.constant 0 : index
    %21 = vector.load %arg8[%c1, %c0_27, %c0_28] : memref<9x4x4xbf16, #tpu.memory_space<vmem>>, vector<1x4x4xbf16>
    %22 = vector.shape_cast %21 : vector<1x4x4xbf16> to vector<4x4xbf16>
    %cst_29 = arith.constant dense<0.000000e+00> : vector<64x4xf32>
    %23 = tpu.matmul %20, %22, %cst_29 {dimension_numbers = #tpu.dot_dimension_numbers<[1], [0], [0], [1], [0, 0, 1, 1], [], []>} : vector<64x4xbf16>, vector<4x4xbf16>, vector<64x4xf32> -> vector<64x4xf32>
    %24 = arith.addf %19, %23 : vector<64x4xf32>
    %25 = vector.shape_cast %14 : vector<8x8x4xbf16> to vector<64x4xbf16>
    %c2 = arith.constant 2 : index
    %c0_30 = arith.constant 0 : index
    %c0_31 = arith.constant 0 : index
    %26 = vector.load %arg8[%c2, %c0_30, %c0_31] : memref<9x4x4xbf16, #tpu.memory_space<vmem>>, vector<1x4x4xbf16>
    %27 = vector.shape_cast %26 : vector<1x4x4xbf16> to vector<4x4xbf16>
    %cst_32 = arith.constant dense<0.000000e+00> : vector<64x4xf32>
    %28 = tpu.matmul %25, %27, %cst_32 {dimension_numbers = #tpu.dot_dimension_numbers<[1], [0], [0], [1], [0, 0, 1, 1], [], []>} : vector<64x4xbf16>, vector<4x4xbf16>, vector<64x4xf32> -> vector<64x4xf32>
    %29 = arith.addf %24, %28 : vector<64x4xf32>
    %30 = vector.extract_strided_slice %3 {offsets = [0, 0, 0], sizes = [8, 8, 4], strides = [1, 1, 1]} : vector<8x9x4xbf16> to vector<8x8x4xbf16>
    %31 = vector.extract_strided_slice %3 {offsets = [0, 1, 0], sizes = [8, 8, 4], strides = [1, 1, 1]} : vector<8x9x4xbf16> to vector<8x8x4xbf16>
    %32 = vector.shape_cast %30 : vector<8x8x4xbf16> to vector<64x4xbf16>
    %c3 = arith.constant 3 : index
    %c0_33 = arith.constant 0 : index
    %c0_34 = arith.constant 0 : index
    %33 = vector.load %arg8[%c3, %c0_33, %c0_34] : memref<9x4x4xbf16, #tpu.memory_space<vmem>>, vector<1x4x4xbf16>
    %34 = vector.shape_cast %33 : vector<1x4x4xbf16> to vector<4x4xbf16>
    %cst_35 = arith.constant dense<0.000000e+00> : vector<64x4xf32>
    %35 = tpu.matmul %32, %34, %cst_35 {dimension_numbers = #tpu.dot_dimension_numbers<[1], [0], [0], [1], [0, 0, 1, 1], [], []>} : vector<64x4xbf16>, vector<4x4xbf16>, vector<64x4xf32> -> vector<64x4xf32>
    %36 = arith.addf %29, %35 : vector<64x4xf32>
    %37 = vector.shape_cast %9 : vector<8x8x4xbf16> to vector<64x4xbf16>
    %c4 = arith.constant 4 : index
    %c0_36 = arith.constant 0 : index
    %c0_37 = arith.constant 0 : index
    %38 = vector.load %arg8[%c4, %c0_36, %c0_37] : memref<9x4x4xbf16, #tpu.memory_space<vmem>>, vector<1x4x4xbf16>
    %39 = vector.shape_cast %38 : vector<1x4x4xbf16> to vector<4x4xbf16>
    %cst_38 = arith.constant dense<0.000000e+00> : vector<64x4xf32>
    %40 = tpu.matmul %37, %39, %cst_38 {dimension_numbers = #tpu.dot_dimension_numbers<[1], [0], [0], [1], [0, 0, 1, 1], [], []>} : vector<64x4xbf16>, vector<4x4xbf16>, vector<64x4xf32> -> vector<64x4xf32>
    %41 = arith.addf %36, %40 : vector<64x4xf32>
    %42 = vector.shape_cast %31 : vector<8x8x4xbf16> to vector<64x4xbf16>
    %c5 = arith.constant 5 : index
    %c0_39 = arith.constant 0 : index
    %c0_40 = arith.constant 0 : index
    %43 = vector.load %arg8[%c5, %c0_39, %c0_40] : memref<9x4x4xbf16, #tpu.memory_space<vmem>>, vector<1x4x4xbf16>
    %44 = vector.shape_cast %43 : vector<1x4x4xbf16> to vector<4x4xbf16>
    %cst_41 = arith.constant dense<0.000000e+00> : vector<64x4xf32>
    %45 = tpu.matmul %42, %44, %cst_41 {dimension_numbers = #tpu.dot_dimension_numbers<[1], [0], [0], [1], [0, 0, 1, 1], [], []>} : vector<64x4xbf16>, vector<4x4xbf16>, vector<64x4xf32> -> vector<64x4xf32>
    %46 = arith.addf %41, %45 : vector<64x4xf32>
    %47 = vector.extract_strided_slice %5 {offsets = [0, 0, 0], sizes = [8, 8, 4], strides = [1, 1, 1]} : vector<8x9x4xbf16> to vector<8x8x4xbf16>
    %48 = vector.extract_strided_slice %5 {offsets = [0, 1, 0], sizes = [8, 8, 4], strides = [1, 1, 1]} : vector<8x9x4xbf16> to vector<8x8x4xbf16>
    %49 = vector.shape_cast %47 : vector<8x8x4xbf16> to vector<64x4xbf16>
    %c6 = arith.constant 6 : index
    %c0_42 = arith.constant 0 : index
    %c0_43 = arith.constant 0 : index
    %50 = vector.load %arg8[%c6, %c0_42, %c0_43] : memref<9x4x4xbf16, #tpu.memory_space<vmem>>, vector<1x4x4xbf16>
    %51 = vector.shape_cast %50 : vector<1x4x4xbf16> to vector<4x4xbf16>
    %cst_44 = arith.constant dense<0.000000e+00> : vector<64x4xf32>
    %52 = tpu.matmul %49, %51, %cst_44 {dimension_numbers = #tpu.dot_dimension_numbers<[1], [0], [0], [1], [0, 0, 1, 1], [], []>} : vector<64x4xbf16>, vector<4x4xbf16>, vector<64x4xf32> -> vector<64x4xf32>
    %53 = arith.addf %46, %52 : vector<64x4xf32>
    %54 = vector.shape_cast %11 : vector<8x8x4xbf16> to vector<64x4xbf16>
    %c7 = arith.constant 7 : index
    %c0_45 = arith.constant 0 : index
    %c0_46 = arith.constant 0 : index
    %55 = vector.load %arg8[%c7, %c0_45, %c0_46] : memref<9x4x4xbf16, #tpu.memory_space<vmem>>, vector<1x4x4xbf16>
    %56 = vector.shape_cast %55 : vector<1x4x4xbf16> to vector<4x4xbf16>
    %cst_47 = arith.constant dense<0.000000e+00> : vector<64x4xf32>
    %57 = tpu.matmul %54, %56, %cst_47 {dimension_numbers = #tpu.dot_dimension_numbers<[1], [0], [0], [1], [0, 0, 1, 1], [], []>} : vector<64x4xbf16>, vector<4x4xbf16>, vector<64x4xf32> -> vector<64x4xf32>
    %58 = arith.addf %53, %57 : vector<64x4xf32>
    %59 = vector.shape_cast %48 : vector<8x8x4xbf16> to vector<64x4xbf16>
    %c8 = arith.constant 8 : index
    %c0_48 = arith.constant 0 : index
    %c0_49 = arith.constant 0 : index
    %60 = vector.load %arg8[%c8, %c0_48, %c0_49] : memref<9x4x4xbf16, #tpu.memory_space<vmem>>, vector<1x4x4xbf16>
    %61 = vector.shape_cast %60 : vector<1x4x4xbf16> to vector<4x4xbf16>
    %cst_50 = arith.constant dense<0.000000e+00> : vector<64x4xf32>
    %62 = tpu.matmul %59, %61, %cst_50 {dimension_numbers = #tpu.dot_dimension_numbers<[1], [0], [0], [1], [0, 0, 1, 1], [], []>} : vector<64x4xbf16>, vector<4x4xbf16>, vector<64x4xf32> -> vector<64x4xf32>
    %63 = arith.addf %58, %62 : vector<64x4xf32>
    %c0_51 = arith.constant 0 : index
    %c0_52 = arith.constant 0 : index
    %64 = vector.load %arg9[%c0_51, %c0_52] : memref<1x4xf32, #tpu.memory_space<vmem>>, vector<1x4xf32>
    %65 = vector.broadcast %64 : vector<1x4xf32> to vector<64x4xf32>
    %66 = arith.addf %63, %65 : vector<64x4xf32>
    %cst_53 = arith.constant 0.000000e+00 : f32
    %67 = vector.broadcast %cst_53 : f32 to vector<64x4xf32>
    %68 = arith.cmpf ogt, %66, %67 : vector<64x4xf32>
    %cst_54 = arith.constant 0.00999999977 : f32
    %69 = vector.broadcast %cst_54 : f32 to vector<64x4xf32>
    %70 = arith.mulf %69, %66 : vector<64x4xf32>
    %71 = arith.select %68, %66, %70 : vector<64x4xi1>, vector<64x4xf32>
    %72 = vector.shape_cast %71 : vector<64x4xf32> to vector<1x8x8x4xf32>
    %c0_55 = arith.constant 0 : index
    %c0_56 = arith.constant 0 : index
    %c0_57 = arith.constant 0 : index
    %c0_58 = arith.constant 0 : index
    %73 = vector.load %arg10[%c0_55, %c0_56, %c0_57, %c0_58] : memref<1x8x8x4xf32, #tpu.memory_space<vmem>>, vector<1x8x8x4xf32>
    tpu.vector_store %arg10[%c0_55, %c0_56, %c0_57, %c0_58], %72 {strides = array<i32>} : memref<1x8x8x4xf32, #tpu.memory_space<vmem>>, vector<1x8x8x4xf32>,
    return
  }
  func.func @transform_0(%arg0: i32, %arg1: i32) -> (i32, i32, i32, i32) {
    %c0_i32 = arith.constant 0 : i32
    %c0_i32_0 = arith.constant 0 : i32
    %c0_i32_1 = arith.constant 0 : i32
    return %arg0, %arg1, %c0_i32, %c0_i32_0 : i32, i32, i32, i32
  }
  func.func @transform_1(%arg0: i32, %arg1: i32) -> (i32, i32, i32, i32) {
    %c0_i32 = arith.constant 0 : i32
    %c0_i32_0 = arith.constant 0 : i32
    %c0_i32_1 = arith.constant 0 : i32
    return %arg0, %arg1, %c0_i32, %c0_i32_0 : i32, i32, i32, i32
  }
  func.func @transform_2(%arg0: i32, %arg1: i32) -> (i32, i32, i32, i32) {
    %c0_i32 = arith.constant 0 : i32
    %c0_i32_0 = arith.constant 0 : i32
    %c0_i32_1 = arith.constant 0 : i32
    return %arg0, %arg1, %c0_i32, %c0_i32_0 : i32, i32, i32, i32
  }
  func.func @transform_3(%arg0: i32, %arg1: i32) -> (i32, i32, i32, i32) {
    %c0_i32 = arith.constant 0 : i32
    %c0_i32_0 = arith.constant 0 : i32
    %c0_i32_1 = arith.constant 0 : i32
    return %arg0, %arg1, %c0_i32, %c0_i32_0 : i32, i32, i32, i32
  }
  func.func @transform_4(%arg0: i32, %arg1: i32) -> (i32, i32, i32, i32) {
    %c0_i32 = arith.constant 0 : i32
    %c0_i32_0 = arith.constant 0 : i32
    %c0_i32_1 = arith.constant 0 : i32
    return %arg0, %arg1, %c0_i32, %c0_i32_0 : i32, i32, i32, i32
  }
  func.func @transform_5(%arg0: i32, %arg1: i32) -> (i32, i32, i32, i32) {
    %c0_i32 = arith.constant 0 : i32
    %c0_i32_0 = arith.constant 0 : i32
    %c0_i32_1 = arith.constant 0 : i32
    return %arg0, %arg1, %c0_i32, %c0_i32_0 : i32, i32, i32, i32
  }
  func.func @transform_6(%arg0: i32, %arg1: i32) -> (i32, i32, i32) {
    %c0_i32 = arith.constant 0 : i32
    %c0_i32_0 = arith.constant 0 : i32
    %c0_i32_1 = arith.constant 0 : i32
    %c0_i32_2 = arith.constant 0 : i32
    return %c0_i32, %c0_i32_0, %c0_i32_1 : i32, i32, i32
  }
  func.func @transform_7(%arg0: i32, %arg1: i32) -> (i32, i32) {
    %c0_i32 = arith.constant 0 : i32
    %c0_i32_0 = arith.constant 0 : i32
    %c0_i32_1 = arith.constant 0 : i32
    return %c0_i32, %c0_i32_0 : i32, i32
  }
  func.func @transform_8(%arg0: i32, %arg1: i32) -> (i32, i32, i32, i32) {
    %c0_i32 = arith.constant 0 : i32
    %c0_i32_0 = arith.constant 0 : i32
    %c0_i32_1 = arith.constant 0 : i32
    return %arg0, %arg1, %c0_i32, %c0_i32_0 : i32, i32, i32, i32
  }
}

</mosaic_0001>

<bundles_post_ra>
// kernel: downsampling_forward.1
= control target key start
LH: loop header
LB: loop body
LE: loop exit
PB: predicated region body
PF: predicated region fallthrough
CT: control target
= control target key end

     0   :  { %s2567_s27 = smov 0   ;;  %s2569_s28 = smov 0   ;;  %s3010_s0 = inlined_call_operand.vmem [shape: bf16[2,8,9,4], index: 0, kind: input, shape index: {}]   ;;  %s3011_s1 = inlined_call_operand.vmem [shape: bf16[2,8,9,4], index: 1, kind: input, shape index: {}]   ;;  %s3012_s2 = inlined_call_operand.vmem [shape: bf16[2,8,9,4], index: 2, kind: input, shape index: {}]   ;;  %s3013_s3 = inlined_call_operand.vmem [shape: bf16[2,8,8,4], index: 3, kind: input, shape index: {}]   ;;  %s3014_s4 = inlined_call_operand.vmem [shape: bf16[2,8,8,4], index: 4, kind: input, shape index: {}]   ;;  %s3015_s5 = inlined_call_operand.vmem [shape: bf16[2,8,8,4], index: 5, kind: input, shape index: {}]   ;;  %s3016_s6 = inlined_call_operand.vmem [shape: bf16[9,4,4], index: 6, kind: input, shape index: {}]   ;;  %s3017_s7 = inlined_call_operand.vmem [shape: f32[1,4], index: 7, kind: input, shape index: {}]   ;;  %s3018_s8 = inlined_call_operand.vmem [shape: f32[2,8,8,4], index: 8, kind: output, shape index: {}]  }
   0x1   :  { %s2571_s29 = smov 0  }
   0x2 LB: > { %s30_s30 = sadd.s32 1, %s2516_s28  ;;  %p2134_p0 = scmp.ge.s32.totalorder %s2520_s29, 1  ;;  %s2520_s29 = sphi %s2571_s29, %s18_s29   ;;  %s2516_s28 = sphi %s2569_s28, %s3022_s28   ;;  %s2512_s27 = sphi %s2567_s27, %s3021_s27  }
   0x3   : > { %p32_p1 = scmp.ge.s32.totalorder %s30_s30, 2  ;;  %p371_p2 = scmp.lt.s32.totalorder %s2520_s29, 3 }
   0x5   : > { %s3024_s30 = smov (%p32_p1, %s30_s30), 0  ;;  %p372_p3 = pnand %p2134_p0, %p371_p2 }
   0x6   : > { %v2149_v0 = vld [vmem:[%s3016_s6 + $0x2] sm:$0x3] (!%p372_p3)  ;;  %vm643_vm0 = vcmask (!%p372_p3), 1041408   ;;  %v2591_v1 = vld [vmem:[%s3016_s6 + $0x8] sm:$0x3] (!%p372_p3)  ;;  %p462_p4 = scmp.lt.s32.totalorder (!%p372_p3), %s2512_s27, 1 }
   0x7   : > { %375 = sbr.rel (%p372_p3) target bundleno = 320 (0x140), region = 52  ;;  %2440 = vmatprep.subr.msk.bf16.mxu1 (!%p372_p3), %vm643_vm0, %v2149_v0  ;;  %2444 = vmatprep.subr.msk.bf16.mxu0 (!%p372_p3), %vm643_vm0, %v2591_v1  ;;  %v645_v2 = vsel (!%p372_p3), %vm643_vm0, %v2149_v0, 0  ;;  %v2599_v3 = vsel (!%p372_p3), %vm643_vm0, %v2591_v1, 0  ;;  %v607_v4 = vld [vmem:[%s3016_s6] sm:$0x3] (!%p372_p3)  ;;  %vm630_vm1 = vcmask (!%p372_p3), 31744  }
   0x8   : > { %2285 = vmatpush3.bf16.msra.mxu1 (!%p372_p3), %v645_v2  ;;  %2325 = vmatpush3.bf16.msra.mxu0 (!%p372_p3), %v2599_v3  ;;  %v2193_v5 = vld [vmem:[%s3016_s6 + $0xa] sm:$0x3] (!%p372_p3)  ;;  %v745_v6 = vsel (!%p372_p3), %vm643_vm0, %v607_v4, 0  ;;  %vm812_vm2 = vsmask.f32 (!%p372_p3), 3328 }
   0x9   : > { %2441 = vmatprep.subr.msk.bf16.mxu1 (!%p372_p3), %vm643_vm0, %v607_v4  ;;  %2446 = vmatprep.subr.msk.bf16.mxu0 (!%p372_p3), %vm643_vm0, %v2193_v5  ;;  %v1388_v7 = vsel (!%p372_p3), %vm643_vm0, %v2193_v5, 0  ;;  %vm813_vm3 = vsmask.f32 (!%p372_p3), 7440  ;;  %v2202_v17 = vld [vmem:[%s3016_s6 + $0xc] sm:$0x3] (!%p372_p3) }
   0xa   : > { %v2166_v18 = vld [vmem:[%s3016_s6 + $0x4] sm:$0x3] (!%p372_p3)  ;;  %vm2672_vm4 = vmor (!%p372_p3), %vm812_vm2, %vm813_vm3  ;;  %v1498_v4 = vsel (!%p372_p3), %vm643_vm0, %v2202_v17, 0 }
   0xe   : > { %s3026_s27 = smov (!%p462_p4, %s2512_s27), 1 }
   0xf   : > { %s2610_s17 = sshll.u32 %s3026_s27, 6  ;;  %s2612_s18 = sshll.u32 %s3026_s27, 5 }
  0x10   : > { %s2618_s21 = scalar_lea.vmem %s3011_s1, %s2610_s17  ;;  %s502_s24 = scalar_lea.vmem %s3013_s3, %s2612_s18 }
  0x11   : > { %v2627_v8 = vld [vmem:[%s2618_s21] sm:$0xf]  ;;  %v552_v9 = vld [vmem:[%s2618_s21 + $0x4] sm:$0x1]  ;;  %s2634_s27 = scalar_lea.vmem %s3014_s4, %s2612_s18  ;;  %v2637_v11 = vld [vmem:[%s2618_s21 + $0x8] sm:$0xf]  ;;  %s2658_s15 = scalar_lea.vmem %s3010_s0, %s2610_s17 }
  0x12   : > { %v2474_v10 = vld [vmem:[%s502_s24] sm:$0xff]   ;;  %v1250_v12 = vshrl.u32 %v2627_v8, 16  ;;  %v1253_v14 = vshll.u32 %v2627_v8, 16  ;;  %v2476_v15 = vld [vmem:[%s502_s24 + $0x8] sm:$0xff]   ;;  %v2478_v21 = vld [vmem:[%s502_s24 + $0x10] sm:$0xff]   ;;  %v1259_v22 = vshll.u32 %v552_v9, 16  ;;  %s2823_s9 = scalar_lea.vmem %s3015_s5, %s2612_s18  ;;  %s2983_s14 = scalar_lea.vmem %s3018_s8, %s2610_s17 }
  0x13   : > { %v2475_v13 = vld [vmem:[%s2634_s27] sm:$0xff]   ;;  %2286 = vmatprep.mubr.msk.bf16.mxu1 %vm630_vm1, %v2474_v10  ;;  %v2477_v19 = vld [vmem:[%s2634_s27 + $0x8] sm:$0xff]   ;;  %v1264_v24 = vshrl.u32 %v2637_v11, 16  ;;  %v2479_v25 = vld [vmem:[%s502_s24 + $0x18] sm:$0xff]   ;;  %v1267_v28 = vshll.u32 %v2637_v11, 16  ;;  %s2763_s24 = scalar_lea.vmem %s3012_s2, %s2610_s17 }
  0x14   : > { %v1252_v16 = vrot.slane %v1250_v12, 4  ;;  %2326 = vmatprep.mubr.msk.bf16.mxu0 %vm630_vm1, %v2475_v13  ;;  %v1255_v20 = vrot.slane %v1253_v14, 5  ;;  %2287 = vmatmul.mubr.msk.bf16.vlgmr.msra.gmra.mrb[0].mxu1 %vm630_vm1, %v2476_v15  ;;  %v554_v26 = vld [vmem:[%s2618_s21 + $0xc] sm:$0x1]  ;;  %v1261_v27 = vrot.slane %v1259_v22, 5 }
  0x15   : > { %2295 = vmatpush3.bf16.msra.mxu1 %v745_v6  ;;  %2327 = vmatmul.mubr.msk.bf16.vlgmr.msra.gmra.mrb[0].mxu0 %vm630_vm1, %v2477_v19  ;;  %v2664_v29 = vld [vmem:[%s2618_s21 + $0x10] sm:$0xf]  ;;  %v1266_v31 = vrot.slane %v1264_v24, 4  ;;  %v1273_v32 = vshll.u32 %v554_v26, 16  ;;  %v556_v33 = vld [vmem:[%s2618_s21 + $0x14] sm:$0x1] }
  0x16   : > { %v1256_v23 = vor.u32 %v1255_v20, %v1252_v16  ;;  %2335 = vmatpush3.bf16.msra.mxu0 %v1388_v7  ;;  %2290 = vmatprep.mubr.msk.bf16.mxu1 %vm630_vm1, %v2478_v21  ;;  %v1278_v34 = vshrl.u32 %v2664_v29, 16  ;;  %v1269_v36 = vrot.slane %v1267_v28, 5  ;;  %v2677_v37 = vld [vmem:[%s2618_s21 + $0x18] sm:$0xf]  ;;  %v558_v38 = vld [vmem:[%s2618_s21 + $0x1c] sm:$0x1] }
  0x17   : > { %2447 = vmatprep.subr.msk.bf16.mxu0 %vm643_vm0, %v2202_v17  ;;  %2442 = vmatprep.subr.msk.bf16.mxu1 %vm643_vm0, %v2166_v18  ;;  %v1281_v39 = vshll.u32 %v2664_v29, 16  ;;  %v1275_v40 = vrot.slane %v1273_v32, 5  ;;  %v1287_v42 = vshll.u32 %v556_v33, 16  ;;  %v535_v43 = vld [vmem:[%s2658_s15] sm:$0xf]  ;;  %v1292_v46 = vshrl.u32 %v2677_v37, 16 }
  0x18   : > { %v1257_v30 = vrot.slane %v1256_v23, 4  ;;  %v1280_v41 = vrot.slane %v1278_v34, 4  ;;  %v1270_v44 = vor.u32 %v1269_v36, %v1266_v31  ;;  %v1295_v47 = vshll.u32 %v2677_v37, 16  ;;  %v2685_v48 = vld [vmem:[%s2658_s15 + $0x8] sm:$0xf] }
  0x19   : > { %v1283_v45 = vrot.slane %v1281_v39, 5  ;;  %v1289_v50 = vrot.slane %v1287_v42, 5  ;;  %v1301_v51 = vshll.u32 %v558_v38, 16  ;;  %v2158_v52 = vcombine.low %v535_v43, %v2685_v48  ;;  %v2693_v58 = vld [vmem:[%s2658_s15 + $0x10] sm:$0xf] }
  0x1a   : > { %v1262_v49 = vsel %vm2672_vm4, %v1257_v30, %v1261_v27  ;;  %v1271_v53 = vrot.slane %v1270_v44, 4  ;;  %v1294_v55 = vrot.slane %v1292_v46, 4  ;;  %v1297_v56 = vrot.slane %v1295_v47, 5  ;;  %v2696_v59 = vld [vmem:[%s2658_s15 + $0x18] sm:$0xf] }
  0x1b   : > { %v1284_v54 = vor.u32 %v1283_v45, %v1280_v41  ;;  %v816_v57 = vshrl.u32 %v535_v43, 16  ;;  %v1303_v63 = vrot.slane %v1301_v51, 5  ;;  %v2701_v0 = vld [vmem:[%s2618_s21 + $0x20] sm:$0xf]  ;;  %v819_v5 = vshll.u32 %v535_v43, 16 }
  0x1c   : > { %2291 = vmatmul.mubr.msk.bf16.gmra.mrb[4].mxu1 %vm630_vm1, %v2479_v25  ;;  %v1276_v60 = vsel %vm2672_vm4, %v1271_v53, %v1275_v40  ;;  %v1298_v62 = vor.u32 %v1297_v56, %v1294_v55  ;;  %v954_v6 = vsel %vm643_vm0, %v2166_v18, 0  ;;  %v830_v10 = vshrl.u32 %v2685_v48, 16  ;;  %v560_v13 = vld [vmem:[%s2618_s21 + $0x24] sm:$0x1]  ;;  %v2715_v15 = vld [vmem:[%s2618_s21 + $0x28] sm:$0xf] }
  0x1d   : > { %2296 = vmatprep.mubr.msk.bf16.mxu1 %vm630_vm1, %v2158_v52  ;;  %v1285_v61 = vrot.slane %v1284_v54, 4  ;;  %v2194_v2 = vcombine.low %v1262_v49, %v1276_v60  ;;  %v2159_v12 = vcombine.low %v2693_v58, %v2696_v59  ;;  %v2712_v14 = vrot.slane %v816_v57, 4  ;;  %v2721_v17 = vld [vmem:[%s3016_s6 + $0x6] sm:$0x3]  ;;  %v562_v20 = vld [vmem:[%s2618_s21 + $0x2c] sm:$0x1] }
  0x1e   : > { %v1299_v9 = vrot.slane %v1298_v62, 4  ;;  %v1306_v16 = vshrl.u32 %v2701_v0, 16  ;;  %v833_v19 = vshll.u32 %v2685_v48, 16  ;;  %v1309_v21 = vshll.u32 %v2701_v0, 16  ;;  %v2729_v22 = vld [vmem:[%s2618_s21 + $0x30] sm:$0xf] }
  0x1f   : > { %v1290_v7 = vsel %vm2672_vm4, %v1285_v61, %v1289_v50  ;;  %2336 = vmatprep.mubr.msk.bf16.mxu0 %vm630_vm1, %v2194_v2  ;;  %v2734_v23 = vld [vmem:[%s3016_s6 + $0xe] sm:$0x3]  ;;  %v2736_v25 = vrot.slane %v819_v5, 5  ;;  %v1315_v26 = vshll.u32 %v560_v13, 16  ;;  %v564_v27 = vld [vmem:[%s2618_s21 + $0x34] sm:$0x1] }
  0x20   : > { %v1304_v18 = vsel %vm2672_vm4, %v1299_v9, %v1303_v63  ;;  %v2740_v28 = vld [vmem:[%s2618_s21 + $0x38] sm:$0xf]  ;;  %v2742_v30 = vrot.slane %v830_v10, 4  ;;  %v1308_v31 = vrot.slane %v1306_v16, 4  ;;  %v1311_v32 = vrot.slane %v1309_v21, 5 }
  0x21   : > { %v2195_v24 = vcombine.low %v1290_v7, %v1304_v18  ;;  %v1320_v33 = vshrl.u32 %v2715_v15, 16  ;;  %v566_v34 = vld [vmem:[%s2618_s21 + $0x3c] sm:$0x1]  ;;  %v1323_v36 = vshll.u32 %v2715_v15, 16  ;;  %v1329_v38 = vshll.u32 %v562_v20, 16 }
  0x22   : > { %v1334_v39 = vshrl.u32 %v2729_v22, 16  ;;  %v1337_v40 = vshll.u32 %v2729_v22, 16  ;;  %v543_v41 = vld [vmem:[%s2658_s15 + $0x20] sm:$0xf]  ;;  %v1312_v42 = vor.u32 %v1311_v32, %v1308_v31  ;;  %v1343_v44 = vshll.u32 %v564_v27, 16 }
  0x23   : > { %2337 = vmatmul.mubr.msk.bf16.vlgmr.msra.gmra.mrb[0].mxu0 %vm630_vm1, %v2195_v24  ;;  %v1322_v43 = vrot.slane %v1320_v33, 4  ;;  %v1348_v45 = vshrl.u32 %v2740_v28, 16  ;;  %v545_v46 = vld [vmem:[%s2658_s15 + $0x28] sm:$0xf]  ;;  %v1317_v47 = vrot.slane %v1315_v26, 5  ;;  %v1325_v49 = vrot.slane %v1323_v36, 5 }
  0x24   : > { %2297 = vmatmul.mubr.msk.bf16.vlgmr.msra.gmra.mrb[0].mxu1 %vm630_vm1, %v2159_v12  ;;  %2345 = vmatpush3.bf16.msra.mxu0 %v1498_v4  ;;  %v1336_v50 = vrot.slane %v1334_v39, 4  ;;  %v1339_v51 = vrot.slane %v1337_v40, 5  ;;  %v1313_v52 = vrot.slane %v1312_v42, 4  ;;  %v1331_v53 = vrot.slane %v1329_v38, 5  ;;  %v2766_v2 = vld [vmem:[%s2658_s15 + $0x30] sm:$0xf] }
  0x25   : > { %2305 = vmatpush3.bf16.msra.mxu1 %v954_v6  ;;  %2448 = vmatprep.subr.msk.bf16.mxu0 %vm643_vm0, %v2734_v23  ;;  %v1350_v54 = vrot.slane %v1348_v45, 4  ;;  %v1351_v55 = vshll.u32 %v2740_v28, 16  ;;  %v1326_v56 = vor.u32 %v1325_v49, %v1322_v43  ;;  %v1357_v60 = vshll.u32 %v566_v34, 16  ;;  %v2769_v4 = vld [vmem:[%s2658_s15 + $0x38] sm:$0xf] }
  0x26   : > { %2443 = vmatprep.subr.msk.bf16.mxu1 %vm643_vm0, %v2721_v17  ;;  %v1340_v57 = vor.u32 %v1339_v51, %v1336_v50  ;;  %v2160_v61 = vcombine.low %v543_v41, %v545_v46  ;;  %v1345_v62 = vrot.slane %v1343_v44, 5  ;;  %v844_v5 = vshrl.u32 %v2693_v58, 16  ;;  %v2783_v26 = vld [vmem:[%s2763_s24] sm:$0xf]  ;;  %v2786_v27 = vld [vmem:[%s2763_s24 + $0x8] sm:$0xf] }
  0x27   : > { %v1353_v63 = vrot.slane %v1351_v55, 5  ;;  %v1318_v6 = vsel %vm2672_vm4, %v1313_v52, %v1317_v47  ;;  %v1327_v7 = vrot.slane %v1326_v56, 4  ;;  %v847_v10 = vshll.u32 %v2693_v58, 16  ;;  %v2800_v44 = vld [vmem:[%s2763_s24 + $0x10] sm:$0xf] }
  0x28   : > { %v1341_v9 = vrot.slane %v1340_v57, 4  ;;  %2300 = vmatprep.mubr.msk.bf16.mxu1 %vm630_vm1, %v2160_v61  ;;  %v858_v12 = vshrl.u32 %v2696_v59, 16  ;;  %v1359_v16 = vrot.slane %v1357_v60, 5  ;;  %v861_v18 = vshll.u32 %v2696_v59, 16  ;;  %v2803_v45 = vld [vmem:[%s2763_s24 + $0x18] sm:$0xf] }
  0x29   : > { %v1354_v13 = vor.u32 %v1353_v63, %v1350_v54  ;;  %v1332_v20 = vsel %vm2672_vm4, %v1327_v7, %v1331_v53  ;;  %v872_v21 = vshrl.u32 %v543_v41, 16  ;;  %v2161_v24 = vcombine.low %v2766_v2, %v2769_v4  ;;  %v536_v49 = vld [vmem:[%s2658_s15 + $0x4] sm:$0x1]  ;;  %v538_v50 = vld [vmem:[%s2658_s15 + $0xc] sm:$0x1] }
  0x2a   : > { %v2196_v31 = vcombine.low %v1318_v6, %v1332_v20  ;;  %v1346_v58 = vsel %vm2672_vm4, %v1341_v9, %v1345_v62  ;;  %v875_v33 = vshll.u32 %v543_v41, 16  ;;  %v835_v59 = vrot.slane %v833_v19, 5  ;;  %v540_v55 = vld [vmem:[%s2658_s15 + $0x14] sm:$0x1]  ;;  %v542_v62 = vld [vmem:[%s2658_s15 + $0x1c] sm:$0x1] }
  0x2b   : > { %v1355_v32 = vrot.slane %v1354_v13, 4  ;;  %v846_v34 = vrot.slane %v844_v5, 4  ;;  %v886_v36 = vshrl.u32 %v545_v46, 16  ;;  %v889_v38 = vshll.u32 %v545_v46, 16  ;;  %v2839_v7 = vld [vmem:[%s2763_s24 + $0x20] sm:$0xf] }
  0x2c   : > { %2301 = vmatmul.mubr.msk.bf16.gmra.mrb[4].mxu1 %vm630_vm1, %v2161_v24  ;;  %v849_v39 = vrot.slane %v847_v10, 5  ;;  %2340 = vmatprep.mubr.msk.bf16.mxu0 %vm630_vm1, %v2196_v31  ;;  %v900_v42 = vshrl.u32 %v2766_v2, 16  ;;  %v2203_v48 = vcombine.low %v2783_v26, %v2786_v27  ;;  %v860_v19 = vrot.slane %v858_v12, 4 }
  0x2d   : > { %v1360_v40 = vsel %vm2672_vm4, %v1355_v32, %v1359_v16  ;;  %v863_v41 = vrot.slane %v861_v18, 5  ;;  %v2805_v46 = vrot.slane %v872_v21, 4  ;;  %v2807_v47 = vrot.slane %v875_v33, 5  ;;  %v2844_v21 = vld [vmem:[%s2763_s24 + $0x28] sm:$0xf] }
  0x2e   : > { %v2197_v43 = vcombine.low %v1346_v58, %v1360_v40  ;;  %v2812_v51 = vrot.slane %v886_v36, 4  ;;  %v2814_v52 = vrot.slane %v889_v38, 5  ;;  %v903_v53 = vshll.u32 %v2766_v2, 16  ;;  %v2860_v38 = vld [vmem:[%s2763_s24 + $0x30] sm:$0xf] }
  0x2f   : > { %v914_v54 = vshrl.u32 %v2769_v4, 16  ;;  %v2825_v56 = vrot.slane %v900_v42, 4  ;;  %v917_v57 = vshll.u32 %v2769_v4, 16  ;;  %v1684_v60 = vshrl.u32 %v2783_v26, 16 }
  0x30   : > { %2341 = vmatmul.mubr.msk.bf16.gmra.mrb[4].mxu0 %vm630_vm1, %v2197_v43  ;;  %v1687_v61 = vshll.u32 %v2783_v26, 16  ;;  %v1698_v63 = vshrl.u32 %v2786_v27, 16  ;;  %v1701_v2 = vshll.u32 %v2786_v27, 16  ;;  %v2204_v5 = vcombine.low %v2800_v44, %v2803_v45 }
  0x31   : > { %2346 = vmatprep.mubr.msk.bf16.mxu0 %vm630_vm1, %v2203_v48  ;;  %v822_v6 = vor.u32 %v2736_v25, %v2712_v14  ;;  %v1712_v4 = vshrl.u32 %v2800_v44, 16  ;;  %v825_v9 = vshll.u32 %v536_v49, 16  ;;  %v836_v10 = vor.u32 %v835_v59, %v2742_v30  ;;  %v2849_v14 = vld [vmem:[%s3016_s6 + $0x10] sm:$0x3]  ;;  %v2867_v48 = vld [vmem:[%s2763_s24 + $0x38] sm:$0xf] }
  0x32   : > { %v839_v12 = vshll.u32 %v538_v50, 16  ;;  %v850_v16 = vor.u32 %v849_v39, %v846_v34  ;;  %v853_v18 = vshll.u32 %v540_v55, 16  ;;  %v864_v20 = vor.u32 %v863_v41, %v860_v19  ;;  %v544_v50 = vld [vmem:[%s2658_s15 + $0x24] sm:$0x1] }
  0x33   : > { %v823_v13 = vrot.slane %v822_v6, 4  ;;  %v827_v24 = vrot.slane %v825_v9, 5  ;;  %v837_v26 = vrot.slane %v836_v10, 4  ;;  %v867_v31 = vshll.u32 %v542_v62, 16 }
  0x34   : > { %v841_v27 = vrot.slane %v839_v12, 5  ;;  %v1608_v25 = vsel %vm643_vm0, %v2734_v23, 0  ;;  %v851_v30 = vrot.slane %v850_v16, 4  ;;  %v855_v58 = vrot.slane %v853_v18, 5  ;;  %v548_v12 = vld [vmem:[%s2658_s15 + $0x34] sm:$0x1] }
  0x35   : > { %v865_v32 = vrot.slane %v864_v20, 4  ;;  %v828_v33 = vsel %vm2672_vm4, %v823_v13, %v827_v24  ;;  %v869_v34 = vrot.slane %v867_v31, 5  ;;  %v2205_v36 = vcombine.low %v2839_v7, %v2844_v21  ;;  %v2488_v16 = vld [vmem:[%s2823_s9] sm:$0xff]  }
  0x36   : > { %v842_v59 = vsel %vm2672_vm4, %v837_v26, %v841_v27  ;;  %v905_v39 = vrot.slane %v903_v53, 5  ;;  %v1715_v23 = vshll.u32 %v2800_v44, 16  ;;  %v856_v42 = vsel %vm2672_vm4, %v851_v30, %v855_v58  ;;  %v568_v30 = vld [vmem:[%s2763_s24 + $0x4] sm:$0x1] }
  0x37   : > { %v2167_v40 = vcombine.low %v828_v33, %v842_v59  ;;  %v916_v19 = vrot.slane %v914_v54, 4  ;;  %v919_v41 = vrot.slane %v917_v57, 5  ;;  %v1726_v43 = vshrl.u32 %v2803_v45, 16  ;;  %v546_v54 = vld [vmem:[%s2658_s15 + $0x2c] sm:$0x1] }
  0x38   : > { %2347 = vmatmul.mubr.msk.bf16.vlgmr.msra.gmra.mrb[0].mxu0 %vm630_vm1, %v2204_v5  ;;  %v870_v49 = vsel %vm2672_vm4, %v865_v32, %v869_v34  ;;  %v1686_v53 = vrot.slane %v1684_v60, 4  ;;  %v1689_v44 = vrot.slane %v1687_v61, 5  ;;  %v1064_v62 = vsel %vm643_vm0, %v2721_v17, 0  ;;  %v570_v33 = vld [vmem:[%s2763_s24 + $0xc] sm:$0x1] }
  0x39   : > { %2355 = vmatpush3.bf16.msra.mxu0 %v1608_v25  ;;  %2350 = vmatprep.mubr.msk.bf16.mxu0 %vm630_vm1, %v2205_v36  ;;  %v2168_v55 = vcombine.low %v856_v42, %v870_v49  ;;  %v1700_v57 = vrot.slane %v1698_v63, 4  ;;  %v1703_v5 = vrot.slane %v1701_v2, 5  ;;  %v2880_v6 = vrot.slane %v1712_v4, 4  ;;  %v550_v4 = vld [vmem:[%s2658_s15 + $0x3c] sm:$0x1] }
  0x3a   : > { %2306 = vmatprep.mubr.msk.bf16.mxu1 %vm630_vm1, %v2167_v40  ;;  %2449 = vmatprep.subr.msk.bf16.mxu0 %vm643_vm0, %v2849_v14  ;;  %v1729_v60 = vshll.u32 %v2803_v45, 16  ;;  %v2883_v9 = vrot.slane %v1715_v23, 5  ;;  %v2206_v61 = vcombine.low %v2860_v38, %v2867_v48  ;;  %v878_v17 = vor.u32 %v2807_v47, %v2805_v46 }
  0x3b   : > { %2307 = vmatmul.mubr.msk.bf16.vlgmr.msra.gmra.mrb[0].mxu1 %vm630_vm1, %v2168_v55  ;;  %v881_v10 = vshll.u32 %v544_v50, 16  ;;  %v2891_v13 = vrot.slane %v1726_v43, 4  ;;  %v1740_v63 = vshrl.u32 %v2839_v7, 16  ;;  %v892_v45 = vor.u32 %v2814_v52, %v2812_v51  ;;  %v2489_v43 = vld [vmem:[%s2823_s9 + $0x8] sm:$0xff]   ;;  %v2492_v55 = vld [vmem:[%s2823_s9 + $0x10] sm:$0xff]  }
  0x3c   : > { %2315 = vmatpush3.bf16.msra.mxu1 %v1064_v62  ;;  %v895_v2 = vshll.u32 %v546_v54, 16  ;;  %v1743_v18 = vshll.u32 %v2839_v7, 16  ;;  %v879_v20 = vrot.slane %v878_v17, 4  ;;  %v906_v46 = vor.u32 %v905_v39, %v2825_v56 }
  0x3d   : > { %v883_v24 = vrot.slane %v881_v10, 5  ;;  %2445 = vmatprep.subr.msk.bf16.mxu1 %vm643_vm0, %v2591_v1  ;;  %v893_v47 = vrot.slane %v892_v45, 4  ;;  %v909_v27 = vshll.u32 %v548_v12, 16  ;;  %v920_v31 = vor.u32 %v919_v41, %v916_v19  ;;  %v576_v12 = vld [vmem:[%s2763_s24 + $0x24] sm:$0x1] }
  0x3e   : > { %v897_v26 = vrot.slane %v895_v2, 5  ;;  %v907_v52 = vrot.slane %v906_v46, 4  ;;  %v923_v25 = vshll.u32 %v550_v4, 16  ;;  %v2176_v7 = vcombine.low %v2627_v8, %v2637_v11 }
  0x3f   : > { %v884_v51 = vsel %vm2672_vm4, %v879_v20, %v883_v24  ;;  %v1754_v56 = vshrl.u32 %v2844_v21, 16  ;;  %v911_v58 = vrot.slane %v909_v27, 5  ;;  %v921_v32 = vrot.slane %v920_v31, 4 }
  0x40   : > { %2351 = vmatmul.mubr.msk.bf16.gmra.mrb[4].mxu0 %vm630_vm1, %v2206_v61  ;;  %v898_v1 = vsel %vm2672_vm4, %v893_v47, %v897_v26  ;;  %v1731_v59 = vrot.slane %v1729_v60, 5  ;;  %v1757_v34 = vshll.u32 %v2844_v21, 16  ;;  %v925_v39 = vrot.slane %v923_v25, 5  ;;  %v574_v61 = vld [vmem:[%s2763_s24 + $0x1c] sm:$0x1] }
  0x41   : > { %2356 = vmatprep.mubr.msk.bf16.mxu0 %vm630_vm1, %v2488_v16  ;;  %v2169_v36 = vcombine.low %v884_v51, %v898_v1  ;;  %v912_v8 = vsel %vm2672_vm4, %v907_v52, %v911_v58  ;;  %v1690_v11 = vor.u32 %v1689_v44, %v1686_v53  ;;  %v1693_v23 = vshll.u32 %v568_v30, 16  ;;  %v572_v53 = vld [vmem:[%s2763_s24 + $0x14] sm:$0x1]  ;;  %v2493_v51 = vld [vmem:[%s2823_s9 + $0x18] sm:$0xff]  }
  0x42   : > { %v1704_v40 = vor.u32 %v1703_v5, %v1700_v57  ;;  %v1742_v42 = vrot.slane %v1740_v63, 4  ;;  %v1745_v19 = vrot.slane %v1743_v18, 5  ;;  %v926_v41 = vsel %vm2672_vm4, %v921_v32, %v925_v39  ;;  %v578_v63 = vld [vmem:[%s2763_s24 + $0x2c] sm:$0x1]  ;;  %v580_v1 = vld [vmem:[%s2763_s24 + $0x34] sm:$0x1] }
  0x43   : > { %2310 = vmatprep.mubr.msk.bf16.mxu1 %vm630_vm1, %v2169_v36  ;;  %v1707_v21 = vshll.u32 %v570_v33, 16  ;;  %v1756_v49 = vrot.slane %v1754_v56, 4  ;;  %v2170_v50 = vcombine.low %v912_v8, %v926_v41  ;;  %v1691_v62 = vrot.slane %v1690_v11, 4 }
  0x44   : > { %v1695_v54 = vrot.slane %v1693_v23, 5  ;;  %v1759_v44 = vrot.slane %v1757_v34, 5  ;;  %v1822_v57 = vsel %vm643_vm0, %v2849_v14, 0  ;;  %v1705_v5 = vrot.slane %v1704_v40, 4  ;;  %v582_v34 = vld [vmem:[%s2763_s24 + $0x3c] sm:$0x1] }
  0x45   : > { %v1709_v60 = vrot.slane %v1707_v21, 5  ;;  %v1768_v17 = vshrl.u32 %v2860_v38, 16  ;;  %v1771_v10 = vshll.u32 %v2860_v38, 16  ;;  %2311 = vmatmul.mubr.msk.bf16.gmra.mrb[4].mxu1 %vm630_vm1, %v2170_v50  ;;  %v1782_v45 = vshrl.u32 %v2867_v48, 16  ;;  %v2496_v40 = vld [vmem:[%s2634_s27 + $0x10] sm:$0xff]   ;;  %v2497_v50 = vld [vmem:[%s2634_s27 + $0x18] sm:$0xff]  }
  0x46   : > { %v1785_v2 = vshll.u32 %v2867_v48, 16  ;;  %2316 = vmatprep.mubr.msk.bf16.mxu1 %vm630_vm1, %v2176_v7  ;;  %v1718_v14 = vor.u32 %v2883_v9, %v2880_v6  ;;  %v1721_v4 = vshll.u32 %v572_v53, 16  ;;  %v1696_v38 = vsel %vm2672_vm4, %v1691_v62, %v1695_v54 }
  0x47   : > { %v1732_v16 = vor.u32 %v1731_v59, %v2891_v13  ;;  %v1735_v18 = vshll.u32 %v574_v61, 16  ;;  %v1746_v20 = vor.u32 %v1745_v19, %v1742_v42  ;;  %v1710_v48 = vsel %vm2672_vm4, %v1705_v5, %v1709_v60 }
  0x48   : > { %2357 = vmatmul.mubr.msk.bf16.vlgmr.msra.gmra.mrb[0].mxu0 %vm630_vm1, %v2489_v43  ;;  %v1749_v24 = vshll.u32 %v576_v12, 16  ;;  %v1760_v46 = vor.u32 %v1759_v44, %v1756_v49  ;;  %v1763_v47 = vshll.u32 %v578_v63, 16  ;;  %v1770_v6 = vrot.slane %v1768_v17, 4 }
  0x49   : > { %2365 = vmatpush3.bf16.msra.mxu0 %v1822_v57  ;;  %2360 = vmatprep.mubr.msk.bf16.mxu0 %vm630_vm1, %v2492_v55  ;;  %v1773_v9 = vrot.slane %v1771_v10, 5  ;;  %v2177_v26 = vcombine.low %v2664_v29, %v2677_v37  ;;  %v1784_v27 = vrot.slane %v1782_v45, 4  ;;  %v1787_v31 = vrot.slane %v1785_v2, 5  ;;  %v2229_v57 = vld [vmem:[%s3017_s7] ss:$0 sm:$0xff] }
  0x4a   : > { %v1719_v52 = vrot.slane %v1718_v14, 4  ;;  %v1723_v13 = vrot.slane %v1721_v4, 5  ;;  %v2178_v25 = vcombine.low %v2701_v0, %v2715_v15  ;;  %v2221_v7 = vcombine.low %v1696_v38, %v1710_v48 }
  0x4b   : > { %v1733_v30 = vrot.slane %v1732_v16, 4  ;;  %v1737_v56 = vrot.slane %v1735_v18, 5  ;;  %v1747_v58 = vrot.slane %v1746_v20, 4  ;;  %v1751_v32 = vrot.slane %v1749_v24, 5 }
  0x4c   : > { %v1761_v33 = vrot.slane %v1760_v46, 4  ;;  %v1765_v59 = vrot.slane %v1763_v47, 5  ;;  %v1724_v29 = vsel %vm2672_vm4, %v1719_v52, %v1723_v13  ;;  %v1774_v37 = vor.u32 %v1773_v9, %v1770_v6 }
  0x4d   : > { %2317 = vmatmul.mubr.msk.bf16.vlgmr.msra.gmra.mrb[0].mxu1 %vm630_vm1, %v2177_v26  ;;  %v1738_v0 = vsel %vm2672_vm4, %v1733_v30, %v1737_v56  ;;  %v1777_v15 = vshll.u32 %v580_v1, 16  ;;  %v1788_v36 = vor.u32 %v1787_v31, %v1784_v27  ;;  %v1791_v39 = vshll.u32 %v582_v34, 16 }
  0x4e   : > { %2375 = vmatpush3.bf16.msra.mxu1 %v2599_v3  ;;  %2320 = vmatprep.mubr.msk.bf16.mxu1 %vm630_vm1, %v2178_v25  ;;  %v1752_v8 = vsel %vm2672_vm4, %v1747_v58, %v1751_v32  ;;  %v1766_v3 = vsel %vm2672_vm4, %v1761_v33, %v1765_v59  ;;  %v2179_v11 = vcombine.low %v2729_v22, %v2740_v28  ;;  %v1775_v42 = vrot.slane %v1774_v37, 4 }
  0x4f   : > { %v2222_v23 = vcombine.low %v1724_v29, %v1738_v0  ;;  %v2223_v19 = vcombine.low %v1752_v8, %v1766_v3  ;;  %v1779_v41 = vrot.slane %v1777_v15, 5  ;;  %v1789_v43 = vrot.slane %v1788_v36, 4 }
  0x50   : > { %2361 = vmatmul.mubr.msk.bf16.gmra.mrb[4].mxu0 %vm630_vm1, %v2493_v51  ;;  %v1793_v21 = vrot.slane %v1791_v39, 5 }
  0x51   : > { %2366 = vmatprep.mubr.msk.bf16.mxu0 %vm630_vm1, %v2221_v7  ;;  %v1780_v49 = vsel %vm2672_vm4, %v1775_v42, %v1779_v41 }
  0x52   : > { %v1794_v22 = vsel %vm2672_vm4, %v1789_v43, %v1793_v21 }
  0x53   : > { %v2224_v28 = vcombine.low %v1780_v49, %v1794_v22 }
  0x55   : > { %2321 = vmatmul.mubr.msk.bf16.gmra.mrb[4].mxu1 %vm630_vm1, %v2179_v11 }
  0x56   : > { %2330 = vmatprep.mubr.msk.bf16.mxu1 %vm630_vm1, %v2496_v40 }
  0x58   : > { %2367 = vmatmul.mubr.msk.bf16.vlgmr.msra.gmra.mrb[0].mxu0 %vm630_vm1, %v2222_v23 }
  0x59   : > { %2370 = vmatprep.mubr.msk.bf16.mxu0 %vm630_vm1, %v2223_v19 }
  0x60   : > { %2371 = vmatmul.mubr.msk.bf16.gmra.mrb[4].mxu0 %vm630_vm1, %v2224_v28 }
  0x61   : > { %2331 = vmatmul.mubr.msk.bf16.vlgmr.msra.gmra.mrb[4].mxu1 %vm630_vm1, %v2497_v50 }
 0x120   : > { %v2318_v55 = vpop.f32.mrb[0].mxu1 }
 0x121   : > { %v1100_v62 = vpop.f32.mrb[1].mxu1 }
 0x122   : > { %v2319_v54 = vpop.f32.mrb[2].mxu1 }
 0x123   : > { %v1103_v53 = vpop.f32.mrb[3].mxu1 }
 0x12b   : > { %v2368_v44 = vpop.f32.mrb[0].mxu0 }
 0x12c   : > { %v2376_v5 = vadd.f32 %v2368_v44, %v2318_v55  ;;  %v1858_v60 = vpop.f32.mrb[1].mxu0 }
 0x12d   : > { %v2377_v35 = vadd.f32 %v1858_v60, %v1100_v62  ;;  %v2369_v61 = vpop.f32.mrb[2].mxu0 }
 0x12e   : > { %v1906_v17 = vadd.f32 %v2376_v5, %v2229_v57  ;;  %v2378_v10 = vadd.f32 %v2369_v61, %v2319_v54  ;;  %v1861_v12 = vpop.f32.mrb[3].mxu0 }
 0x12f   : > { %v1904_v63 = vadd.f32 %v2377_v35, %v2229_v57  ;;  %v2379_v45 = vadd.f32 %v1861_v12, %v1103_v53 }
 0x130   : > { %vm1914_vm5 = vcmp.gt.f32.partialorder %v1906_v17, 0.0  ;;  %v1922_v2 = vmul.f32 0.01, %v1906_v17  ;;  %v1907_v14 = vadd.f32 %v2378_v10, %v2229_v57 }
 0x131   : > { %vm1912_vm6 = vcmp.gt.f32.partialorder %v1904_v63, 0.0  ;;  %v1920_v4 = vmul.f32 0.01, %v1904_v63  ;;  %v1905_v38 = vadd.f32 %v2379_v45, %v2229_v57 }
 0x132   : > { %v1930_v16 = vsel %vm1914_vm5, %v1906_v17, %v1922_v2  ;;  %vm1915_vm7 = vcmp.gt.f32.partialorder %v1907_v14, 0.0  ;;  %v1923_v18 = vmul.f32 0.01, %v1907_v14 }
 0x133   : > { %1938 = vst.msk [vmem:[%s2983_s14 + $0x10] sm:$0xff] %vm630_vm1, %v1930_v16  ;;  %v1928_v20 = vsel %vm1912_vm6, %v1904_v63, %v1920_v4  ;;  %vm1913_vm8 = vcmp.gt.f32.partialorder %v1905_v38, 0.0  ;;  %v1921_v48 = vmul.f32 0.01, %v1905_v38  ;;  %v2372_v24 = vpop.f32.mrb[4].mxu0 }
 0x134   : > { %1936 = vst.msk [vmem:[%s2983_s14] sm:$0xff] %vm630_vm1, %v1928_v20  ;;  %v1931_v46 = vsel %vm1915_vm7, %v1907_v14, %v1923_v18  ;;  %v1874_v47 = vpop.f32.mrb[5].mxu0  ;;  %v2332_v26 = vpop.f32.mrb[4].mxu1 }
 0x135   : > { %1939 = vst.msk [vmem:[%s2983_s14 + $0x18] sm:$0xff] %vm630_vm1, %v1931_v46  ;;  %v1929_v6 = vsel %vm1913_vm8, %v1905_v38, %v1921_v48  ;;  %v2373_v9 = vpop.f32.mrb[6].mxu0  ;;  %v2380_v31 = vadd.f32 %v2372_v24, %v2332_v26  ;;  %v1226_v51 = vpop.f32.mrb[5].mxu1 }
 0x136   : > { %1937 = vst.msk [vmem:[%s2983_s14 + $0x8] sm:$0xff] %vm630_vm1, %v1929_v6  ;;  %v1877_v27 = vpop.f32.mrb[7].mxu0  ;;  %v2381_v52 = vadd.f32 %v1874_v47, %v1226_v51  ;;  %v2333_v13 = vpop.f32.mrb[6].mxu1 }
 0x137   : > { %v1910_v25 = vadd.f32 %v2380_v31, %v2229_v57  ;;  %v2382_v7 = vadd.f32 %v2373_v9, %v2333_v13  ;;  %v1229_v30 = vpop.f32.mrb[7].mxu1 }
 0x138   : > { %v1908_v56 = vadd.f32 %v2381_v52, %v2229_v57  ;;  %v2383_v1 = vadd.f32 %v1877_v27, %v1229_v30 }
 0x139   : > { %vm1918_vm9 = vcmp.gt.f32.partialorder %v1910_v25, 0.0  ;;  %v1926_v58 = vmul.f32 0.01, %v1910_v25  ;;  %v1911_v32 = vadd.f32 %v2382_v7, %v2229_v57 }
 0x13a   : > { %vm1916_vm10 = vcmp.gt.f32.partialorder %v1908_v56, 0.0  ;;  %v1924_v33 = vmul.f32 0.01, %v1908_v56  ;;  %v1909_v59 = vadd.f32 %v2383_v1, %v2229_v57 }
 0x13b   : > { %v1934_v34 = vsel %vm1918_vm9, %v1910_v25, %v1926_v58  ;;  %vm1919_vm11 = vcmp.gt.f32.partialorder %v1911_v32, 0.0  ;;  %v1927_v29 = vmul.f32 0.01, %v1911_v32 }
 0x13c   : > { %1942 = vst.msk [vmem:[%s2983_s14 + $0x30] sm:$0xff] %vm630_vm1, %v1934_v34  ;;  %v1932_v37 = vsel %vm1916_vm10, %v1908_v56, %v1924_v33  ;;  %vm1917_vm12 = vcmp.gt.f32.partialorder %v1909_v59, 0.0  ;;  %v1925_v0 = vmul.f32 0.01, %v1909_v59 }
 0x13d   : > { %1940 = vst.msk [vmem:[%s2983_s14 + $0x20] sm:$0xff] %vm630_vm1, %v1932_v37  ;;  %v1935_v15 = vsel %vm1919_vm11, %v1911_v32, %v1927_v29 }
 0x13e   : > { %1943 = vst.msk [vmem:[%s2983_s14 + $0x38] sm:$0xff] %vm630_vm1, %v1935_v15  ;;  %v1933_v36 = vsel %vm1917_vm12, %v1909_v59, %v1925_v0 }
 0x13f   : > { %1941 = vst.msk [vmem:[%s2983_s14 + $0x28] sm:$0xff] %vm630_vm1, %v1933_v36 }
 0x140 PF: > { %s18_s29 = sadd.s32 1, %s2520_s29   ;;  %s3021_s27 = smov %s2516_s28 }
 0x141   : > { %p15_p5 = scmp.ge.s32.totalorder %s18_s29, 4   ;;  %s3022_s28 = smov %s3024_s30 }
 0x143   :  { %17 = sbr.rel (!%p15_p5) target bundleno = 2 (0x2), region = 105 }

</bundles_post_ra>
